<compile_context>
chip_gen: v7x
topology: tpu7x:2x2x1
jax: 0.10.0
libtpu: 0.0.40
codegen_flags: <defaults>
</compile_context>

<pallas_src>
import functools

import numpy as np
import jax
import jax.numpy as jnp
from jax.experimental import pallas as pl
from jax.experimental.pallas import tpu as pltpu


# ------------------------------ Pallas kernel ------------------------------

def _block_cnn_kernel(x_ref, wcat_ref, aff_ref, o_ref, lhs_ref, *,
                      NB, H, W, C, KH, PAD):
    """NB batch elements per step: (BN -> ReLU -> 'same' Conv) applied twice.

    x_ref    : (NB*H, W*C)        activation, rows=(n,h), lanes=(w,c)
    wcat_ref : (KH*W*C, W*C)      all H-taps concatenated along K
    aff_ref  : (4, W*C)           rows: scale, shift, shift+scale*bias, bias
    o_ref    : (NB*H, W*C)        output
    lhs_ref  : (NB*H, KH*W*C)     VMEM scratch, staged matmul LHS
    """
    WC = W * C

    # Zero the per-batch H-halo cells of the staged LHS.  Interiors are fully
    # overwritten by every conv, halos are never touched afterwards; re-zero
    # every grid step (a few KB) so correctness is independent of grid
    # sharding / scratch reuse.
    for i in range(KH):
        s = i - PAD                       # H shift of tap i
        if s == 0:
            continue
        lo, hi = ((0, -s) if s < 0 else (H - s, H))     # halo rows per batch
        zeros = jnp.zeros((hi - lo, WC), jnp.float32)
        for b in range(NB):
            lhs_ref[b * H + lo: b * H + hi, i * WC:(i + 1) * WC] = zeros

    scale = aff_ref[0:1, :]
    shift1 = aff_ref[1:2, :]
    shift2 = aff_ref[2:3, :]              # = shift1 + scale*bias (bias folded)
    bias = aff_ref[3:4, :]

    def conv(act):                        # act: (NB*H, WC) -> (NB*H, WC) f32
        # Scatter the KH H-shifted copies of `act` into the lane chunks of the
        # staged LHS (all stores lane-aligned at i*WC), then ONE lane-dense
        # MXU matmul accumulates every tap in-MXU.
        for i in range(KH):
            s = i - PAD
            if s == 0:                    # center tap: one aligned full store
                lhs_ref[:, i * WC:(i + 1) * WC] = act
            else:
                for b in range(NB):
                    if s > 0:
                        lhs_ref[b * H: b * H + H - s, i * WC:(i + 1) * WC] = \
                            act[b * H + s: b * H + H, :]
                    else:
                        lhs_ref[b * H - s: b * H + H, i * WC:(i + 1) * WC] = \
                            act[b * H: b * H + H + s, :]
        return jnp.dot(lhs_ref[...], wcat_ref[...],
                       preferred_element_type=jnp.float32)

    # block_CNN.forward: same bn / conv parameters used twice.
    a1 = jnp.maximum(x_ref[...] * scale + shift1, 0.0)
    y1 = conv(a1)                         # conv1 bias folded into shift2
    a2 = jnp.maximum(y1 * scale + shift2, 0.0)
    o_ref[...] = conv(a2) + bias


# ------------------------------- wrapper ------------------------------------

def block_cnn_forward(packed, x_nchw, nb=None):
    """packed = (wcat, aff) from pack_params."""
    wcat, aff = packed
    N, C, H, W = x_nchw.shape
    KHWC, WC = wcat.shape
    KH = KHWC // WC
    PAD = (KH - 1) // 2
    assert WC == W * C and KHWC == KH * WC

    if nb is None:                        # stack batches to raise matmul M
        nb = max(d for d in range(1, min(N, 8) + 1) if N % d == 0)
    assert N % nb == 0

    # NCHW -> rows=(n,h), lanes=(w,c)  (layout glue kept in XLA to preserve
    # the module's NCHW interface).
    x2d = jnp.transpose(x_nchw, (0, 2, 3, 1)).reshape(N * H, WC)
    x2d = x2d.astype(jnp.float32)

    out2d = pl.pallas_call(
        functools.partial(_block_cnn_kernel,
                          NB=nb, H=H, W=W, C=C, KH=KH, PAD=PAD),
        out_shape=jax.ShapeDtypeStruct((N * H, WC), jnp.float32),
        grid=(N // nb,),
        in_specs=[
            pl.BlockSpec((nb * H, WC), lambda n: (n, 0)),     # activations
            pl.BlockSpec((KHWC, WC), lambda n: (0, 0)),       # concat weights
            pl.BlockSpec((4, WC), lambda n: (0, 0)),          # affine rows
        ],
        out_specs=pl.BlockSpec((nb * H, WC), lambda n: (n, 0)),
        scratch_shapes=[pltpu.VMEM((nb * H, KHWC), jnp.float32)],
        compiler_params=pltpu.CompilerParams(
            dimension_semantics=("parallel",)),
    )(x2d, wcat, aff)

    # rows=(n,h), lanes=(w,c) -> NCHW, matching the PyTorch module's output.
    return out2d.reshape(N, H, W, C).transpose(0, 3, 1, 2)


# ------------------------------ parameters ----------------------------------

def init_params(key, block_index):
    """Mirrors block_CNN.__init__ (deterministic random init)."""
    C, K = (8, 7) if block_index == 1 else (16, 3)
    k_w, k_b, k_g, k_beta, k_m = jax.random.split(key, 5)
    bound = 1.0 / float(np.sqrt(C * K * K))
    weight = jax.random.uniform(k_w, (C, C, K, K), jnp.float32, -bound, bound)  # OIHW
    bias = jax.random.uniform(k_b, (C,), jnp.float32, -bound, bound)
    gamma = 1.0 + 0.1 * jax.random.uniform(k_g, (C,), jnp.float32, -1.0, 1.0)
    beta = 0.1 * jax.random.uniform(k_beta, (C,), jnp.float32, -1.0, 1.0)
    mean = 0.05 * jax.random.uniform(k_m, (C,), jnp.float32, -1.0, 1.0)
    var = jnp.ones((C,), jnp.float32)
    return dict(weight=weight, bias=bias, gamma=gamma, beta=beta,
                mean=mean, var=var, eps=1e-5, C=C, K=K)


def pack_params(p, W):
    """Precompute kernel operands for spatial width W (once, in numpy):
       * expand the conv weight into KH W-banded matrices with the 'same'
         W-padding folded into the band (clipped at the edges) and concatenate
         them along K -> a single (KH*W*C, W*C) matmul weight,
       * fold BN running stats into per-channel affine rows; fold the inner
         conv bias into the outer BN shift."""
    weight = np.asarray(p["weight"], np.float32)           # (Cout, Cin, KH, KW)
    Cout, Cin, KH, KW = weight.shape
    PAD = (KW - 1) // 2

    w_t = np.transpose(weight, (2, 3, 1, 0))               # (KH, KW, Cin, Cout)
    # kw = w_in - w_out + PAD, valid iff 0 <= kw < KW  ('same' padding in W)
    j = np.arange(W)[:, None] - np.arange(W)[None, :] + PAD   # (W_in, W_out)
    valid = (j >= 0) & (j < KW)
    tap = w_t[:, np.clip(j, 0, KW - 1)]                    # (KH, W, W, Cin, Cout)
    tap = tap * valid[None, :, :, None, None]
    # rows: (kh, w_in, c_in)  -> i*W*C + w_in*C + c_in ;  cols: w_out*C + c_out
    wcat = np.ascontiguousarray(
        np.transpose(tap, (0, 1, 3, 2, 4))).reshape(KH * W * Cin, W * Cout)

    scale = np.asarray(p["gamma"]) / np.sqrt(np.asarray(p["var"]) + p["eps"])
    shift = np.asarray(p["beta"]) - np.asarray(p["mean"]) * scale
    bias = np.asarray(p["bias"])
    shift2 = shift + scale * bias                          # inner bias folded
    aff = np.stack([np.tile(scale, W), np.tile(shift, W),
                    np.tile(shift2, W), np.tile(bias, W)], axis=0)  # (4, W*C)

    return jnp.asarray(wcat, jnp.float32), jnp.asarray(aff, jnp.float32)


# -------------------------- pure-JAX reference -------------------------------

def ref_forward(p, x):
    scale = p["gamma"] / jnp.sqrt(p["var"] + p["eps"])
    shift = p["beta"] - p["mean"] * scale

    def bn_relu(v):
        return jnp.maximum(v * scale[None, :, None, None]
                           + shift[None, :, None, None], 0.0)

    def conv(v):
        y = jax.lax.conv_general_dilated(
            v, p["weight"], window_strides=(1, 1), padding="SAME",
            dimension_numbers=("NCHW", "OIHW", "NCHW"))
        return y + p["bias"][None, :, None, None]

    return conv(bn_relu(conv(bn_relu(x))))


# --------------------------------- main --------------------------------------

if __name__ == "__main__":
    key = jax.random.PRNGKey(0)
    k_p1, k_p2, k_x1, k_x2 = jax.random.split(key, 4)
    N, H, W = 2, 16, 16

    for block_index, kp, kx in ((1, k_p1, k_x1), (2, k_p2, k_x2)):
        params = init_params(kp, block_index)
        C = params["C"]
        x = jax.random.normal(kx, (N, C, H, W), dtype=jnp.float32)

        packed = pack_params(params, W)
        fwd = jax.jit(functools.partial(block_cnn_forward, packed))
        out = jax.block_until_ready(fwd(x))
        assert out.shape == (N, C, H, W), out.shape

        ref = jax.block_until_ready(ref_forward(params, x))
        max_err = float(jnp.max(jnp.abs(out - ref)))
        assert np.isfinite(max_err) and max_err < 1e-3, (block_index, max_err)

    print("KERNEL_OK")
</pallas_src>

<mosaic_0001>
module attributes {stable_mosaic.version = 11 : i64} {
  func.func @_block_cnn_kernel(%arg0: i32, %arg1: memref<32x128xf32, #tpu.memory_space<vmem>>, %arg2: memref<896x128xf32, #tpu.memory_space<vmem>>, %arg3: memref<4x128xf32, #tpu.memory_space<vmem>>, %arg4: memref<32x128xf32, #tpu.memory_space<vmem>>, %arg5: memref<32x896xf32, #tpu.memory_space<vmem>>) attributes {dimension_semantics = [#tpu.dimension_semantics<parallel>], iteration_bounds = array<i64: 1>, scalar_prefetch = 0 : i64, scratch_operands = 1 : i64, tpu.core_type = #tpu.core_type<tc>, window_params = [{transform_indices = @transform_0, window_bounds = array<i64: 32, 128>}, {pipeline_mode = #tpu.pipeline_mode<synchronous>, transform_indices = @transform_1, window_bounds = array<i64: 896, 128>}, {pipeline_mode = #tpu.pipeline_mode<synchronous>, transform_indices = @transform_2, window_bounds = array<i64: 4, 128>}, {transform_indices = @transform_3, window_bounds = array<i64: 32, 128>}]} {
    %cst = arith.constant 0.000000e+00 : f32
    %0 = vector.broadcast %cst : f32 to vector<3x128xf32>
    %c0 = arith.constant 0 : index
    %c0_0 = arith.constant 0 : index
    %1 = vector.load %arg5[%c0, %c0_0] : memref<32x896xf32, #tpu.memory_space<vmem>>, vector<3x128xf32>
    tpu.vector_store %arg5[%c0, %c0_0], %0 {strides = array<i32>} : memref<32x896xf32, #tpu.memory_space<vmem>>, vector<3x128xf32>,
    %c16 = arith.constant 16 : index
    %c0_1 = arith.constant 0 : index
    %2 = vector.load %arg5[%c16, %c0_1] : memref<32x896xf32, #tpu.memory_space<vmem>>, vector<3x128xf32>
    tpu.vector_store %arg5[%c16, %c0_1], %0 {strides = array<i32>} : memref<32x896xf32, #tpu.memory_space<vmem>>, vector<3x128xf32>,
    %cst_2 = arith.constant 0.000000e+00 : f32
    %3 = vector.broadcast %cst_2 : f32 to vector<2x128xf32>
    %c0_3 = arith.constant 0 : index
    %c128 = arith.constant 128 : index
    %4 = vector.load %arg5[%c0_3, %c128] : memref<32x896xf32, #tpu.memory_space<vmem>>, vector<2x128xf32>
    tpu.vector_store %arg5[%c0_3, %c128], %3 {strides = array<i32>} : memref<32x896xf32, #tpu.memory_space<vmem>>, vector<2x128xf32>,
    %c16_4 = arith.constant 16 : index
    %c128_5 = arith.constant 128 : index
    %5 = vector.load %arg5[%c16_4, %c128_5] : memref<32x896xf32, #tpu.memory_space<vmem>>, vector<2x128xf32>
    tpu.vector_store %arg5[%c16_4, %c128_5], %3 {strides = array<i32>} : memref<32x896xf32, #tpu.memory_space<vmem>>, vector<2x128xf32>,
    %cst_6 = arith.constant 0.000000e+00 : f32
    %6 = vector.broadcast %cst_6 : f32 to vector<1x128xf32>
    %c0_7 = arith.constant 0 : index
    %c256 = arith.constant 256 : index
    %7 = vector.load %arg5[%c0_7, %c256] : memref<32x896xf32, #tpu.memory_space<vmem>>, vector<1x128xf32>
    tpu.vector_store %arg5[%c0_7, %c256], %6 {strides = array<i32>} : memref<32x896xf32, #tpu.memory_space<vmem>>, vector<1x128xf32>,
    %c16_8 = arith.constant 16 : index
    %c256_9 = arith.constant 256 : index
    %8 = vector.load %arg5[%c16_8, %c256_9] : memref<32x896xf32, #tpu.memory_space<vmem>>, vector<1x128xf32>
    tpu.vector_store %arg5[%c16_8, %c256_9], %6 {strides = array<i32>} : memref<32x896xf32, #tpu.memory_space<vmem>>, vector<1x128xf32>,
    %cst_10 = arith.constant 0.000000e+00 : f32
    %9 = vector.broadcast %cst_10 : f32 to vector<1x128xf32>
    %c15 = arith.constant 15 : index
    %c512 = arith.constant 512 : index
    %10 = vector.load %arg5[%c15, %c512] : memref<32x896xf32, #tpu.memory_space<vmem>>, vector<1x128xf32>
    tpu.vector_store %arg5[%c15, %c512], %9 {strides = array<i32>} : memref<32x896xf32, #tpu.memory_space<vmem>>, vector<1x128xf32>,
    %c31 = arith.constant 31 : index
    %c512_11 = arith.constant 512 : index
    %11 = vector.load %arg5[%c31, %c512_11] : memref<32x896xf32, #tpu.memory_space<vmem>>, vector<1x128xf32>
    tpu.vector_store %arg5[%c31, %c512_11], %9 {strides = array<i32>} : memref<32x896xf32, #tpu.memory_space<vmem>>, vector<1x128xf32>,
    %cst_12 = arith.constant 0.000000e+00 : f32
    %12 = vector.broadcast %cst_12 : f32 to vector<2x128xf32>
    %c14 = arith.constant 14 : index
    %c640 = arith.constant 640 : index
    %13 = vector.load %arg5[%c14, %c640] : memref<32x896xf32, #tpu.memory_space<vmem>>, vector<2x128xf32>
    tpu.vector_store %arg5[%c14, %c640], %12 {strides = array<i32>} : memref<32x896xf32, #tpu.memory_space<vmem>>, vector<2x128xf32>,
    %c30 = arith.constant 30 : index
    %c640_13 = arith.constant 640 : index
    %14 = vector.load %arg5[%c30, %c640_13] : memref<32x896xf32, #tpu.memory_space<vmem>>, vector<2x128xf32>
    tpu.vector_store %arg5[%c30, %c640_13], %12 {strides = array<i32>} : memref<32x896xf32, #tpu.memory_space<vmem>>, vector<2x128xf32>,
    %cst_14 = arith.constant 0.000000e+00 : f32
    %15 = vector.broadcast %cst_14 : f32 to vector<3x128xf32>
    %c13 = arith.constant 13 : index
    %c768 = arith.constant 768 : index
    %16 = vector.load %arg5[%c13, %c768] : memref<32x896xf32, #tpu.memory_space<vmem>>, vector<3x128xf32>
    tpu.vector_store %arg5[%c13, %c768], %15 {strides = array<i32>} : memref<32x896xf32, #tpu.memory_space<vmem>>, vector<3x128xf32>,
    %c29 = arith.constant 29 : index
    %c768_15 = arith.constant 768 : index
    %17 = vector.load %arg5[%c29, %c768_15] : memref<32x896xf32, #tpu.memory_space<vmem>>, vector<3x128xf32>
    tpu.vector_store %arg5[%c29, %c768_15], %15 {strides = array<i32>} : memref<32x896xf32, #tpu.memory_space<vmem>>, vector<3x128xf32>,
    %c0_16 = arith.constant 0 : index
    %c0_17 = arith.constant 0 : index
    %18 = vector.load %arg3[%c0_16, %c0_17] : memref<4x128xf32, #tpu.memory_space<vmem>>, vector<1x128xf32>
    %c1 = arith.constant 1 : index
    %c0_18 = arith.constant 0 : index
    %19 = vector.load %arg3[%c1, %c0_18] : memref<4x128xf32, #tpu.memory_space<vmem>>, vector<1x128xf32>
    %c2 = arith.constant 2 : index
    %c0_19 = arith.constant 0 : index
    %20 = vector.load %arg3[%c2, %c0_19] : memref<4x128xf32, #tpu.memory_space<vmem>>, vector<1x128xf32>
    %c3 = arith.constant 3 : index
    %c0_20 = arith.constant 0 : index
    %21 = vector.load %arg3[%c3, %c0_20] : memref<4x128xf32, #tpu.memory_space<vmem>>, vector<1x128xf32>
    %c0_21 = arith.constant 0 : index
    %c0_22 = arith.constant 0 : index
    %22 = vector.load %arg1[%c0_21, %c0_22] : memref<32x128xf32, #tpu.memory_space<vmem>>, vector<32x128xf32>
    %23 = vector.broadcast %18 : vector<1x128xf32> to vector<32x128xf32>
    %24 = arith.mulf %22, %23 : vector<32x128xf32>
    %25 = vector.broadcast %19 : vector<1x128xf32> to vector<32x128xf32>
    %26 = arith.addf %24, %25 : vector<32x128xf32>
    %cst_23 = arith.constant 0.000000e+00 : f32
    %27 = vector.broadcast %cst_23 : f32 to vector<32x128xf32>
    %28 = arith.maximumf %26, %27 : vector<32x128xf32>
    %29 = vector.extract_strided_slice %28 {offsets = [0, 0], sizes = [13, 128], strides = [1, 1]} : vector<32x128xf32> to vector<13x128xf32>
    %c3_24 = arith.constant 3 : index
    %c0_25 = arith.constant 0 : index
    %30 = vector.load %arg5[%c3_24, %c0_25] : memref<32x896xf32, #tpu.memory_space<vmem>>, vector<13x128xf32>
    tpu.vector_store %arg5[%c3_24, %c0_25], %29 {strides = array<i32>} : memref<32x896xf32, #tpu.memory_space<vmem>>, vector<13x128xf32>,
    %31 = vector.extract_strided_slice %28 {offsets = [16, 0], sizes = [13, 128], strides = [1, 1]} : vector<32x128xf32> to vector<13x128xf32>
    %c19 = arith.constant 19 : index
    %c0_26 = arith.constant 0 : index
    %32 = vector.load %arg5[%c19, %c0_26] : memref<32x896xf32, #tpu.memory_space<vmem>>, vector<13x128xf32>
    tpu.vector_store %arg5[%c19, %c0_26], %31 {strides = array<i32>} : memref<32x896xf32, #tpu.memory_space<vmem>>, vector<13x128xf32>,
    %33 = vector.extract_strided_slice %28 {offsets = [0, 0], sizes = [14, 128], strides = [1, 1]} : vector<32x128xf32> to vector<14x128xf32>
    %c2_27 = arith.constant 2 : index
    %c128_28 = arith.constant 128 : index
    %34 = vector.load %arg5[%c2_27, %c128_28] : memref<32x896xf32, #tpu.memory_space<vmem>>, vector<14x128xf32>
    tpu.vector_store %arg5[%c2_27, %c128_28], %33 {strides = array<i32>} : memref<32x896xf32, #tpu.memory_space<vmem>>, vector<14x128xf32>,
    %35 = vector.extract_strided_slice %28 {offsets = [16, 0], sizes = [14, 128], strides = [1, 1]} : vector<32x128xf32> to vector<14x128xf32>
    %c18 = arith.constant 18 : index
    %c128_29 = arith.constant 128 : index
    %36 = vector.load %arg5[%c18, %c128_29] : memref<32x896xf32, #tpu.memory_space<vmem>>, vector<14x128xf32>
    tpu.vector_store %arg5[%c18, %c128_29], %35 {strides = array<i32>} : memref<32x896xf32, #tpu.memory_space<vmem>>, vector<14x128xf32>,
    %37 = vector.extract_strided_slice %28 {offsets = [0, 0], sizes = [15, 128], strides = [1, 1]} : vector<32x128xf32> to vector<15x128xf32>
    %c1_30 = arith.constant 1 : index
    %c256_31 = arith.constant 256 : index
    %38 = vector.load %arg5[%c1_30, %c256_31] : memref<32x896xf32, #tpu.memory_space<vmem>>, vector<15x128xf32>
    tpu.vector_store %arg5[%c1_30, %c256_31], %37 {strides = array<i32>} : memref<32x896xf32, #tpu.memory_space<vmem>>, vector<15x128xf32>,
    %39 = vector.extract_strided_slice %28 {offsets = [16, 0], sizes = [15, 128], strides = [1, 1]} : vector<32x128xf32> to vector<15x128xf32>
    %c17 = arith.constant 17 : index
    %c256_32 = arith.constant 256 : index
    %40 = vector.load %arg5[%c17, %c256_32] : memref<32x896xf32, #tpu.memory_space<vmem>>, vector<15x128xf32>
    tpu.vector_store %arg5[%c17, %c256_32], %39 {strides = array<i32>} : memref<32x896xf32, #tpu.memory_space<vmem>>, vector<15x128xf32>,
    %c0_33 = arith.constant 0 : index
    %c384 = arith.constant 384 : index
    %41 = vector.load %arg5[%c0_33, %c384] : memref<32x896xf32, #tpu.memory_space<vmem>>, vector<32x128xf32>
    tpu.vector_store %arg5[%c0_33, %c384], %28 {strides = array<i32>} : memref<32x896xf32, #tpu.memory_space<vmem>>, vector<32x128xf32>,
    %42 = vector.extract_strided_slice %28 {offsets = [1, 0], sizes = [15, 128], strides = [1, 1]} : vector<32x128xf32> to vector<15x128xf32>
    %c0_34 = arith.constant 0 : index
    %c512_35 = arith.constant 512 : index
    %43 = vector.load %arg5[%c0_34, %c512_35] : memref<32x896xf32, #tpu.memory_space<vmem>>, vector<15x128xf32>
    tpu.vector_store %arg5[%c0_34, %c512_35], %42 {strides = array<i32>} : memref<32x896xf32, #tpu.memory_space<vmem>>, vector<15x128xf32>,
    %44 = vector.extract_strided_slice %28 {offsets = [17, 0], sizes = [15, 128], strides = [1, 1]} : vector<32x128xf32> to vector<15x128xf32>
    %c16_36 = arith.constant 16 : index
    %c512_37 = arith.constant 512 : index
    %45 = vector.load %arg5[%c16_36, %c512_37] : memref<32x896xf32, #tpu.memory_space<vmem>>, vector<15x128xf32>
    tpu.vector_store %arg5[%c16_36, %c512_37], %44 {strides = array<i32>} : memref<32x896xf32, #tpu.memory_space<vmem>>, vector<15x128xf32>,
    %46 = vector.extract_strided_slice %28 {offsets = [2, 0], sizes = [14, 128], strides = [1, 1]} : vector<32x128xf32> to vector<14x128xf32>
    %c0_38 = arith.constant 0 : index
    %c640_39 = arith.constant 640 : index
    %47 = vector.load %arg5[%c0_38, %c640_39] : memref<32x896xf32, #tpu.memory_space<vmem>>, vector<14x128xf32>
    tpu.vector_store %arg5[%c0_38, %c640_39], %46 {strides = array<i32>} : memref<32x896xf32, #tpu.memory_space<vmem>>, vector<14x128xf32>,
    %48 = vector.extract_strided_slice %28 {offsets = [18, 0], sizes = [14, 128], strides = [1, 1]} : vector<32x128xf32> to vector<14x128xf32>
    %c16_40 = arith.constant 16 : index
    %c640_41 = arith.constant 640 : index
    %49 = vector.load %arg5[%c16_40, %c640_41] : memref<32x896xf32, #tpu.memory_space<vmem>>, vector<14x128xf32>
    tpu.vector_store %arg5[%c16_40, %c640_41], %48 {strides = array<i32>} : memref<32x896xf32, #tpu.memory_space<vmem>>, vector<14x128xf32>,
    %50 = vector.extract_strided_slice %28 {offsets = [3, 0], sizes = [13, 128], strides = [1, 1]} : vector<32x128xf32> to vector<13x128xf32>
    %c0_42 = arith.constant 0 : index
    %c768_43 = arith.constant 768 : index
    %51 = vector.load %arg5[%c0_42, %c768_43] : memref<32x896xf32, #tpu.memory_space<vmem>>, vector<13x128xf32>
    tpu.vector_store %arg5[%c0_42, %c768_43], %50 {strides = array<i32>} : memref<32x896xf32, #tpu.memory_space<vmem>>, vector<13x128xf32>,
    %52 = vector.extract_strided_slice %28 {offsets = [19, 0], sizes = [13, 128], strides = [1, 1]} : vector<32x128xf32> to vector<13x128xf32>
    %c16_44 = arith.constant 16 : index
    %c768_45 = arith.constant 768 : index
    %53 = vector.load %arg5[%c16_44, %c768_45] : memref<32x896xf32, #tpu.memory_space<vmem>>, vector<13x128xf32>
    tpu.vector_store %arg5[%c16_44, %c768_45], %52 {strides = array<i32>} : memref<32x896xf32, #tpu.memory_space<vmem>>, vector<13x128xf32>,
    %c0_46 = arith.constant 0 : index
    %c0_47 = arith.constant 0 : index
    %54 = vector.load %arg5[%c0_46, %c0_47] : memref<32x896xf32, #tpu.memory_space<vmem>>, vector<32x896xf32>
    %c0_48 = arith.constant 0 : index
    %c0_49 = arith.constant 0 : index
    %55 = vector.load %arg2[%c0_48, %c0_49] : memref<896x128xf32, #tpu.memory_space<vmem>>, vector<896x128xf32>
    %cst_50 = arith.constant dense<0.000000e+00> : vector<32x128xf32>
    %56 = tpu.matmul %54, %55, %cst_50 {dimension_numbers = #tpu.dot_dimension_numbers<[1], [0], [0], [1], [0, 0, 1, 1], [], []>} : vector<32x896xf32>, vector<896x128xf32>, vector<32x128xf32> -> vector<32x128xf32>
    %57 = vector.broadcast %18 : vector<1x128xf32> to vector<32x128xf32>
    %58 = arith.mulf %56, %57 : vector<32x128xf32>
    %59 = vector.broadcast %20 : vector<1x128xf32> to vector<32x128xf32>
    %60 = arith.addf %58, %59 : vector<32x128xf32>
    %cst_51 = arith.constant 0.000000e+00 : f32
    %61 = vector.broadcast %cst_51 : f32 to vector<32x128xf32>
    %62 = arith.maximumf %60, %61 : vector<32x128xf32>
    %63 = vector.extract_strided_slice %62 {offsets = [0, 0], sizes = [13, 128], strides = [1, 1]} : vector<32x128xf32> to vector<13x128xf32>
    %c3_52 = arith.constant 3 : index
    %c0_53 = arith.constant 0 : index
    %64 = vector.load %arg5[%c3_52, %c0_53] : memref<32x896xf32, #tpu.memory_space<vmem>>, vector<13x128xf32>
    tpu.vector_store %arg5[%c3_52, %c0_53], %63 {strides = array<i32>} : memref<32x896xf32, #tpu.memory_space<vmem>>, vector<13x128xf32>,
    %65 = vector.extract_strided_slice %62 {offsets = [16, 0], sizes = [13, 128], strides = [1, 1]} : vector<32x128xf32> to vector<13x128xf32>
    %c19_54 = arith.constant 19 : index
    %c0_55 = arith.constant 0 : index
    %66 = vector.load %arg5[%c19_54, %c0_55] : memref<32x896xf32, #tpu.memory_space<vmem>>, vector<13x128xf32>
    tpu.vector_store %arg5[%c19_54, %c0_55], %65 {strides = array<i32>} : memref<32x896xf32, #tpu.memory_space<vmem>>, vector<13x128xf32>,
    %67 = vector.extract_strided_slice %62 {offsets = [0, 0], sizes = [14, 128], strides = [1, 1]} : vector<32x128xf32> to vector<14x128xf32>
    %c2_56 = arith.constant 2 : index
    %c128_57 = arith.constant 128 : index
    %68 = vector.load %arg5[%c2_56, %c128_57] : memref<32x896xf32, #tpu.memory_space<vmem>>, vector<14x128xf32>
    tpu.vector_store %arg5[%c2_56, %c128_57], %67 {strides = array<i32>} : memref<32x896xf32, #tpu.memory_space<vmem>>, vector<14x128xf32>,
    %69 = vector.extract_strided_slice %62 {offsets = [16, 0], sizes = [14, 128], strides = [1, 1]} : vector<32x128xf32> to vector<14x128xf32>
    %c18_58 = arith.constant 18 : index
    %c128_59 = arith.constant 128 : index
    %70 = vector.load %arg5[%c18_58, %c128_59] : memref<32x896xf32, #tpu.memory_space<vmem>>, vector<14x128xf32>
    tpu.vector_store %arg5[%c18_58, %c128_59], %69 {strides = array<i32>} : memref<32x896xf32, #tpu.memory_space<vmem>>, vector<14x128xf32>,
    %71 = vector.extract_strided_slice %62 {offsets = [0, 0], sizes = [15, 128], strides = [1, 1]} : vector<32x128xf32> to vector<15x128xf32>
    %c1_60 = arith.constant 1 : index
    %c256_61 = arith.constant 256 : index
    %72 = vector.load %arg5[%c1_60, %c256_61] : memref<32x896xf32, #tpu.memory_space<vmem>>, vector<15x128xf32>
    tpu.vector_store %arg5[%c1_60, %c256_61], %71 {strides = array<i32>} : memref<32x896xf32, #tpu.memory_space<vmem>>, vector<15x128xf32>,
    %73 = vector.extract_strided_slice %62 {offsets = [16, 0], sizes = [15, 128], strides = [1, 1]} : vector<32x128xf32> to vector<15x128xf32>
    %c17_62 = arith.constant 17 : index
    %c256_63 = arith.constant 256 : index
    %74 = vector.load %arg5[%c17_62, %c256_63] : memref<32x896xf32, #tpu.memory_space<vmem>>, vector<15x128xf32>
    tpu.vector_store %arg5[%c17_62, %c256_63], %73 {strides = array<i32>} : memref<32x896xf32, #tpu.memory_space<vmem>>, vector<15x128xf32>,
    %c0_64 = arith.constant 0 : index
    %c384_65 = arith.constant 384 : index
    %75 = vector.load %arg5[%c0_64, %c384_65] : memref<32x896xf32, #tpu.memory_space<vmem>>, vector<32x128xf32>
    tpu.vector_store %arg5[%c0_64, %c384_65], %62 {strides = array<i32>} : memref<32x896xf32, #tpu.memory_space<vmem>>, vector<32x128xf32>,
    %76 = vector.extract_strided_slice %62 {offsets = [1, 0], sizes = [15, 128], strides = [1, 1]} : vector<32x128xf32> to vector<15x128xf32>
    %c0_66 = arith.constant 0 : index
    %c512_67 = arith.constant 512 : index
    %77 = vector.load %arg5[%c0_66, %c512_67] : memref<32x896xf32, #tpu.memory_space<vmem>>, vector<15x128xf32>
    tpu.vector_store %arg5[%c0_66, %c512_67], %76 {strides = array<i32>} : memref<32x896xf32, #tpu.memory_space<vmem>>, vector<15x128xf32>,
    %78 = vector.extract_strided_slice %62 {offsets = [17, 0], sizes = [15, 128], strides = [1, 1]} : vector<32x128xf32> to vector<15x128xf32>
    %c16_68 = arith.constant 16 : index
    %c512_69 = arith.constant 512 : index
    %79 = vector.load %arg5[%c16_68, %c512_69] : memref<32x896xf32, #tpu.memory_space<vmem>>, vector<15x128xf32>
    tpu.vector_store %arg5[%c16_68, %c512_69], %78 {strides = array<i32>} : memref<32x896xf32, #tpu.memory_space<vmem>>, vector<15x128xf32>,
    %80 = vector.extract_strided_slice %62 {offsets = [2, 0], sizes = [14, 128], strides = [1, 1]} : vector<32x128xf32> to vector<14x128xf32>
    %c0_70 = arith.constant 0 : index
    %c640_71 = arith.constant 640 : index
    %81 = vector.load %arg5[%c0_70, %c640_71] : memref<32x896xf32, #tpu.memory_space<vmem>>, vector<14x128xf32>
    tpu.vector_store %arg5[%c0_70, %c640_71], %80 {strides = array<i32>} : memref<32x896xf32, #tpu.memory_space<vmem>>, vector<14x128xf32>,
    %82 = vector.extract_strided_slice %62 {offsets = [18, 0], sizes = [14, 128], strides = [1, 1]} : vector<32x128xf32> to vector<14x128xf32>
    %c16_72 = arith.constant 16 : index
    %c640_73 = arith.constant 640 : index
    %83 = vector.load %arg5[%c16_72, %c640_73] : memref<32x896xf32, #tpu.memory_space<vmem>>, vector<14x128xf32>
    tpu.vector_store %arg5[%c16_72, %c640_73], %82 {strides = array<i32>} : memref<32x896xf32, #tpu.memory_space<vmem>>, vector<14x128xf32>,
    %84 = vector.extract_strided_slice %62 {offsets = [3, 0], sizes = [13, 128], strides = [1, 1]} : vector<32x128xf32> to vector<13x128xf32>
    %c0_74 = arith.constant 0 : index
    %c768_75 = arith.constant 768 : index
    %85 = vector.load %arg5[%c0_74, %c768_75] : memref<32x896xf32, #tpu.memory_space<vmem>>, vector<13x128xf32>
    tpu.vector_store %arg5[%c0_74, %c768_75], %84 {strides = array<i32>} : memref<32x896xf32, #tpu.memory_space<vmem>>, vector<13x128xf32>,
    %86 = vector.extract_strided_slice %62 {offsets = [19, 0], sizes = [13, 128], strides = [1, 1]} : vector<32x128xf32> to vector<13x128xf32>
    %c16_76 = arith.constant 16 : index
    %c768_77 = arith.constant 768 : index
    %87 = vector.load %arg5[%c16_76, %c768_77] : memref<32x896xf32, #tpu.memory_space<vmem>>, vector<13x128xf32>
    tpu.vector_store %arg5[%c16_76, %c768_77], %86 {strides = array<i32>} : memref<32x896xf32, #tpu.memory_space<vmem>>, vector<13x128xf32>,
    %c0_78 = arith.constant 0 : index
    %c0_79 = arith.constant 0 : index
    %88 = vector.load %arg5[%c0_78, %c0_79] : memref<32x896xf32, #tpu.memory_space<vmem>>, vector<32x896xf32>
    %c0_80 = arith.constant 0 : index
    %c0_81 = arith.constant 0 : index
    %89 = vector.load %arg2[%c0_80, %c0_81] : memref<896x128xf32, #tpu.memory_space<vmem>>, vector<896x128xf32>
    %cst_82 = arith.constant dense<0.000000e+00> : vector<32x128xf32>
    %90 = tpu.matmul %88, %89, %cst_82 {dimension_numbers = #tpu.dot_dimension_numbers<[1], [0], [0], [1], [0, 0, 1, 1], [], []>} : vector<32x896xf32>, vector<896x128xf32>, vector<32x128xf32> -> vector<32x128xf32>
    %91 = vector.broadcast %21 : vector<1x128xf32> to vector<32x128xf32>
    %92 = arith.addf %90, %91 : vector<32x128xf32>
    %c0_83 = arith.constant 0 : index
    %c0_84 = arith.constant 0 : index
    %93 = vector.load %arg4[%c0_83, %c0_84] : memref<32x128xf32, #tpu.memory_space<vmem>>, vector<32x128xf32>
    tpu.vector_store %arg4[%c0_83, %c0_84], %92 {strides = array<i32>} : memref<32x128xf32, #tpu.memory_space<vmem>>, vector<32x128xf32>,
    return
  }
  func.func @transform_0(%arg0: i32) -> (i32, i32) {
    %c0_i32 = arith.constant 0 : i32
    %c0_i32_0 = arith.constant 0 : i32
    return %arg0, %c0_i32 : i32, i32
  }
  func.func @transform_1(%arg0: i32) -> (i32, i32) {
    %c0_i32 = arith.constant 0 : i32
    %c0_i32_0 = arith.constant 0 : i32
    %c0_i32_1 = arith.constant 0 : i32
    return %c0_i32, %c0_i32_0 : i32, i32
  }
  func.func @transform_2(%arg0: i32) -> (i32, i32) {
    %c0_i32 = arith.constant 0 : i32
    %c0_i32_0 = arith.constant 0 : i32
    %c0_i32_1 = arith.constant 0 : i32
    return %c0_i32, %c0_i32_0 : i32, i32
  }
  func.func @transform_3(%arg0: i32) -> (i32, i32) {
    %c0_i32 = arith.constant 0 : i32
    %c0_i32_0 = arith.constant 0 : i32
    return %arg0, %c0_i32 : i32, i32
  }
}

</mosaic_0001>

<bundles_post_ra>
// kernel: block_cnn_forward.1
= control target key start
LH: loop header
LB: loop body
LE: loop exit
PB: predicated region body
PF: predicated region fallthrough
CT: control target
= control target key end

     0   :  { %v1873_v3 = vmov 0.0   ;;  %vm73_vm0 = vcmask 1041408   ;;  %vm56_vm1 = vcmask 1042432   ;;  %vm88_vm2 = vcmask 1040384   ;;  %s2647_s1 = inlined_call_operand.vmem [shape: f32[896,128], index: 1, kind: input, shape index: {}]   ;;  %s2648_s2 = inlined_call_operand.vmem [shape: f32[4,128], index: 2, kind: input, shape index: {}]   ;;  %s2649_s0 = inlined_call_operand.vmem [shape: f32[32,128], index: 0, kind: input, shape index: {}]   ;;  %s2650_s3 = inlined_call_operand.vmem [shape: f32[32,128], index: 3, kind: output, shape index: {}]  }
   0x1   :  { %v196_v0 = vld [vmem:[%s2647_s1 + $0x80] sm:$0xff]  ;;  %v197_v1 = vld [vmem:[%s2647_s1 + $0x88] sm:$0xff]  ;;  %16 = vst [vmem:[#allocation2 + $0x8] sm:$0x3] %v1873_v3  ;;  %14 = vst [vmem:[#allocation2] sm:$0x7] %v1873_v3 }
   0x2   :  { %v228_v2 = vld [vmem:[%s2647_s1 + $0x180] sm:$0xff]  ;;  %15 = vst [vmem:[#allocation2 + $0x70] sm:$0x7] %v1873_v3  ;;  %17 = vst [vmem:[#allocation2 + $0x78] sm:$0x3] %v1873_v3  ;;  %v1903_v4 = vpack.c.bf16 %v197_v1, %v196_v0  ;;  %v229_v5 = vld [vmem:[%s2647_s1 + $0x188] sm:$0xff] }
   0x3   :  { %18 = vst [vmem:[#allocation2 + $0x10] sm:$0x1] %v1873_v3  ;;  %19 = vst [vmem:[#allocation2 + $0x80] sm:$0x1] %v1873_v3  ;;  %v180_v6 = vld [vmem:[%s2647_s1] sm:$0xff]  ;;  %v181_v7 = vld [vmem:[%s2647_s1 + $0x8] sm:$0xff]  ;;  %v1914_v8 = vpack.c.bf16 %v229_v5, %v228_v2 }
   0x4   :  { %20 = vst [vmem:[#allocation2 + $0x5f] sm:$0x1] %v1873_v3  ;;  %21 = vst [vmem:[#allocation2 + $0xcf] sm:$0x1] %v1873_v3  ;;  %v1916_v9 = vpack.c.bf16 %v181_v7, %v180_v6  ;;  %v212_v10 = vld [vmem:[%s2647_s1 + $0x100] sm:$0xff]  ;;  %v213_v11 = vld [vmem:[%s2647_s1 + $0x108] sm:$0xff]  ;;  %1617 = vmatprep.subr.bf16.mxu0 %v1903_v4 }
   0x5   :  { %22 = vst [vmem:[#allocation2 + $0x60] sm:$0xc0] %v1873_v3  ;;  %23 = vst [vmem:[#allocation2 + $0xd0] sm:$0xc0] %v1873_v3  ;;  %v198_v12 = vld [vmem:[%s2647_s1 + $0x90] sm:$0xff]  ;;  %v1928_v13 = vpack.c.bf16 %v213_v11, %v212_v10  ;;  %v199_v14 = vld [vmem:[%s2647_s1 + $0x98] sm:$0xff]  ;;  %1649 = vmatprep.subr.bf16.mxu1 %v1914_v8 }
   0x6   :  { %24 = vst [vmem:[#allocation2 + $0x68] sm:$0xe0] %v1873_v3  ;;  %25 = vst [vmem:[#allocation2 + $0xd8] sm:$0xe0] %v1873_v3  ;;  %v230_v15 = vld [vmem:[%s2647_s1 + $0x190] sm:$0xff]  ;;  %v231_v16 = vld [vmem:[%s2647_s1 + $0x198] sm:$0xff]  ;;  %1619 = vmatpush3.bf16.msra.mxu0 %v1916_v9  ;;  %v1941_v17 = vpack.c.bf16 %v199_v14, %v198_v12 }
   0x7   :  { %v1943_v18 = vpack.c.bf16 %v231_v16, %v230_v15  ;;  %v182_v19 = vld [vmem:[%s2647_s1 + $0x10] sm:$0xff]  ;;  %v183_v20 = vld [vmem:[%s2647_s1 + $0x18] sm:$0xff]  ;;  %1651 = vmatpush3.bf16.msra.mxu1 %v1928_v13  ;;  %v200_v24 = vld [vmem:[%s2647_s1 + $0xa0] sm:$0xff]  ;;  %vm122_vm3 = vcmask 1045504   ;;  %vm137_vm4 = vcmask 1044480   ;;  %vm107_vm5 = vcmask 1046528  }
   0x8   :  { %v214_v21 = vld [vmem:[%s2647_s1 + $0x110] sm:$0xff]  ;;  %v1955_v22 = vpack.c.bf16 %v183_v20, %v182_v19  ;;  %v215_v23 = vld [vmem:[%s2647_s1 + $0x118] sm:$0xff]  ;;  %v201_v25 = vld [vmem:[%s2647_s1 + $0xa8] sm:$0xff]  ;;  %1621 = vmatprep.subr.bf16.mxu0 %v1941_v17 }
   0x9   :  { %1653 = vmatprep.subr.bf16.mxu1 %v1943_v18  ;;  %v1968_v26 = vpack.c.bf16 %v215_v23, %v214_v21  ;;  %v1970_v27 = vpack.c.bf16 %v201_v25, %v200_v24  ;;  %v232_v28 = vld [vmem:[%s2647_s1 + $0x1a0] sm:$0xff]  ;;  %v233_v29 = vld [vmem:[%s2647_s1 + $0x1a8] sm:$0xff]  ;;  %v202_v36 = vld [vmem:[%s2647_s1 + $0xb0] sm:$0xff] }
   0xa   :  { %v184_v30 = vld [vmem:[%s2647_s1 + $0x20] sm:$0xff]  ;;  %v1981_v31 = vpack.c.bf16 %v233_v29, %v232_v28  ;;  %v185_v32 = vld [vmem:[%s2647_s1 + $0x28] sm:$0xff]  ;;  %1623 = vmatpush3.bf16.msra.mxu0 %v1955_v22  ;;  %v203_v37 = vld [vmem:[%s2647_s1 + $0xb8] sm:$0xff] }
   0xb   :  { %v216_v33 = vld [vmem:[%s2647_s1 + $0x120] sm:$0xff]  ;;  %v217_v34 = vld [vmem:[%s2647_s1 + $0x128] sm:$0xff]  ;;  %v1993_v35 = vpack.c.bf16 %v185_v32, %v184_v30  ;;  %v234_v38 = vld [vmem:[%s2647_s1 + $0x1b0] sm:$0xff]  ;;  %1655 = vmatpush3.bf16.msra.mxu1 %v1968_v26  ;;  %1625 = vmatprep.subr.bf16.mxu0 %v1970_v27  ;;  %v2008_v40 = vpack.c.bf16 %v203_v37, %v202_v36 }
   0xc   :  { %v2006_v39 = vpack.c.bf16 %v217_v34, %v216_v33  ;;  %v235_v41 = vld [vmem:[%s2647_s1 + $0x1b8] sm:$0xff]  ;;  %v186_v42 = vld [vmem:[%s2647_s1 + $0x30] sm:$0xff]  ;;  %1657 = vmatprep.subr.bf16.mxu1 %v1981_v31  ;;  %v204_v47 = vld [vmem:[%s2647_s1 + $0xc0] sm:$0xff] }
   0xd   :  { %v187_v43 = vld [vmem:[%s2647_s1 + $0x38] sm:$0xff]  ;;  %v2020_v44 = vpack.c.bf16 %v235_v41, %v234_v38  ;;  %v218_v45 = vld [vmem:[%s2647_s1 + $0x130] sm:$0xff]  ;;  %v205_v48 = vld [vmem:[%s2647_s1 + $0xc8] sm:$0xff] }
   0xe   :  { %v219_v46 = vld [vmem:[%s2647_s1 + $0x138] sm:$0xff]  ;;  %v236_v49 = vld [vmem:[%s2647_s1 + $0x1c0] sm:$0xff]  ;;  %v237_v50 = vld [vmem:[%s2647_s1 + $0x1c8] sm:$0xff]  ;;  %1627 = vmatpush3.bf16.msra.mxu0 %v1993_v35  ;;  %v2041_v51 = vpack.c.bf16 %v187_v43, %v186_v42  ;;  %v2047_v53 = vpack.c.bf16 %v205_v48, %v204_v47 }
   0xf   :  { %1659 = vmatpush3.bf16.msra.mxu1 %v2006_v39  ;;  %1629 = vmatprep.subr.bf16.mxu0 %v2008_v40  ;;  %v2045_v52 = vpack.c.bf16 %v219_v46, %v218_v45  ;;  %v188_v54 = vld [vmem:[%s2647_s1 + $0x40] sm:$0xff]  ;;  %v189_v55 = vld [vmem:[%s2647_s1 + $0x48] sm:$0xff]  ;;  %v2059_v57 = vpack.c.bf16 %v237_v50, %v236_v49  ;;  %v206_v59 = vld [vmem:[%s2647_s1 + $0xd0] sm:$0xff] }
  0x10   :  { %v220_v56 = vld [vmem:[%s2647_s1 + $0x140] sm:$0xff]  ;;  %1661 = vmatprep.subr.bf16.mxu1 %v2020_v44  ;;  %v221_v58 = vld [vmem:[%s2647_s1 + $0x148] sm:$0xff]  ;;  %v207_v60 = vld [vmem:[%s2647_s1 + $0xd8] sm:$0xff]  ;;  %v2077_v63 = vpack.c.bf16 %v189_v55, %v188_v54 }
  0x11   :  { %v238_v61 = vld [vmem:[%s2647_s1 + $0x1d0] sm:$0xff]  ;;  %v239_v62 = vld [vmem:[%s2647_s1 + $0x1d8] sm:$0xff]  ;;  %v2081_v0 = vpack.c.bf16 %v221_v58, %v220_v56  ;;  %v2083_v1 = vpack.c.bf16 %v207_v60, %v206_v59  ;;  %v208_v10 = vld [vmem:[%s2647_s1 + $0xe0] sm:$0xff] }
  0x12   :  { %1631 = vmatpush3.bf16.msra.mxu0 %v2041_v51  ;;  %v190_v2 = vld [vmem:[%s2647_s1 + $0x50] sm:$0xff]  ;;  %v191_v3 = vld [vmem:[%s2647_s1 + $0x58] sm:$0xff]  ;;  %v2095_v6 = vpack.c.bf16 %v239_v62, %v238_v61  ;;  %v209_v11 = vld [vmem:[%s2647_s1 + $0xe8] sm:$0xff] }
  0x13   :  { %1663 = vmatpush3.bf16.msra.mxu1 %v2045_v52  ;;  %1633 = vmatprep.subr.bf16.mxu0 %v2047_v53  ;;  %v222_v5 = vld [vmem:[%s2647_s1 + $0x150] sm:$0xff]  ;;  %v223_v7 = vld [vmem:[%s2647_s1 + $0x158] sm:$0xff]  ;;  %v240_v12 = vld [vmem:[%s2647_s1 + $0x1e0] sm:$0xff]  ;;  %v1638_v15 = vpack.c.bf16 %v191_v3, %v190_v2  ;;  %v1640_v23 = vpack.c.bf16 %v209_v11, %v208_v10 }
  0x14   :  { %1665 = vmatprep.subr.bf16.mxu1 %v2059_v57  ;;  %v241_v14 = vld [vmem:[%s2647_s1 + $0x1e8] sm:$0xff]  ;;  %v192_v16 = vld [vmem:[%s2647_s1 + $0x60] sm:$0xff]  ;;  %v2124_v21 = vpack.c.bf16 %v223_v7, %v222_v5  ;;  %v210_v25 = vld [vmem:[%s2647_s1 + $0xf0] sm:$0xff] }
  0x15   :  { %v193_v19 = vld [vmem:[%s2647_s1 + $0x68] sm:$0xff]  ;;  %v224_v20 = vld [vmem:[%s2647_s1 + $0x160] sm:$0xff]  ;;  %v2138_v29 = vpack.c.bf16 %v241_v14, %v240_v12  ;;  %v211_v30 = vld [vmem:[%s2647_s1 + $0xf8] sm:$0xff] }
  0x16   :  { %1635 = vmatpush3.bf16.msra.mxu0 %v2077_v63  ;;  %v225_v24 = vld [vmem:[%s2647_s1 + $0x168] sm:$0xff]  ;;  %v2135_v28 = vld [vmem:[%s2648_s2] ss:$0 sm:$0xff]  ;;  %v2146_v32 = vld [vmem:[%s2648_s2 + $0x1] ss:$0 sm:$0xff]  ;;  %v1642_v38 = vpack.c.bf16 %v193_v19, %v192_v16  ;;  %v1644_v43 = vpack.c.bf16 %v211_v30, %v210_v25 }
  0x17   :  { %1667 = vmatpush3.bf16.msra.mxu1 %v2081_v0  ;;  %1637 = vmatprep.subr.bf16.mxu0 %v2083_v1  ;;  %v30_v33 = vld [vmem:[%s2649_s0] sm:$0xff]  ;;  %v242_v34 = vld [vmem:[%s2647_s1 + $0x1f0] sm:$0xff]  ;;  %v243_v36 = vld [vmem:[%s2647_s1 + $0x1f8] sm:$0xff]  ;;  %v2162_v42 = vpack.c.bf16 %v225_v24, %v224_v20 }
  0x18   :  { %1669 = vmatprep.subr.bf16.mxu1 %v2095_v6  ;;  %v38_v37 = vmul.f32 %v2135_v28, %v30_v33  ;;  %v194_v41 = vld [vmem:[%s2647_s1 + $0x70] sm:$0xff]  ;;  %v195_v45 = vld [vmem:[%s2647_s1 + $0x78] sm:$0xff]  ;;  %v2175_v49 = vpack.c.bf16 %v243_v36, %v242_v34  ;;  %v260_v50 = vld [vmem:[%s2647_s1 + $0x280] sm:$0xff] }
  0x19   :  { %v226_v46 = vld [vmem:[%s2647_s1 + $0x170] sm:$0xff]  ;;  %v227_v47 = vld [vmem:[%s2647_s1 + $0x178] sm:$0xff]  ;;  %v261_v54 = vld [vmem:[%s2647_s1 + $0x288] sm:$0xff]  ;;  %v1646_v59 = vpack.c.bf16 %v195_v45, %v194_v41 }
  0x1a   :  { %1639 = vmatpush3.bf16.msra.mxu0 %v1638_v15  ;;  %v46_v48 = vadd.f32 %v2146_v32, %v38_v37  ;;  %v276_v56 = vld [vmem:[%s2647_s1 + $0x300] sm:$0xff]  ;;  %v277_v58 = vld [vmem:[%s2647_s1 + $0x308] sm:$0xff]  ;;  %v2191_v60 = vpack.c.bf16 %v227_v47, %v226_v46  ;;  %v2197_v3 = vpack.c.bf16 %v261_v54, %v260_v50  ;;  %v278_v14 = vld [vmem:[%s2647_s1 + $0x310] sm:$0xff] }
  0x1b   :  { %1671 = vmatpush3.bf16.msra.mxu1 %v2124_v21  ;;  %1641 = vmatprep.subr.bf16.mxu0 %v1640_v23  ;;  %v2201_v5 = vpack.c.bf16 %v277_v58, %v276_v56  ;;  %v31_v7 = vld [vmem:[%s2649_s0 + $0x8] sm:$0xff]  ;;  %v244_v11 = vld [vmem:[%s2647_s1 + $0x200] sm:$0xff]  ;;  %v279_v15 = vld [vmem:[%s2647_s1 + $0x318] sm:$0xff] }
  0x1c   :  { %1673 = vmatprep.subr.bf16.mxu1 %v2138_v29  ;;  %v2183_v55 = vmax.f32 %v46_v48, 0.0  ;;  %v39_v10 = vmul.f32 %v2135_v28, %v31_v7  ;;  %v245_v12 = vld [vmem:[%s2647_s1 + $0x208] sm:$0xff]  ;;  %v32_v19 = vld [vmem:[%s2649_s0 + $0x10] sm:$0xff]  ;;  %v263_v23 = vld [vmem:[%s2647_s1 + $0x298] sm:$0xff]  ;;  %v2248_v37 = vpack.c.bf16 %v279_v15, %v278_v14 }
  0x1d   :  { %v262_v20 = vld [vmem:[%s2647_s1 + $0x290] sm:$0xff]  ;;  %v40_v24 = vmul.f32 %v2135_v28, %v32_v19  ;;  %v33_v33 = vld [vmem:[%s2649_s0 + $0x18] sm:$0xff]  ;;  %v2243_v34 = vpack.c.bf16 %v245_v12, %v244_v11  ;;  %v281_v41 = vld [vmem:[%s2647_s1 + $0x328] sm:$0xff] }
  0x1e   :  { %1643 = vmatpush3.bf16.msra.mxu0 %v1642_v38  ;;  %v74_v61 = vrot.slane %v2183_v55, 6  ;;  %v57_v62 = vrot.slane %v2183_v55, 5  ;;  %v89_v2 = vrot.slane %v2183_v55, 7  ;;  %441 = vmatprep.mubr.f32.mxu1 %v2183_v55  ;;  %v47_v16 = vadd.f32 %v2146_v32, %v39_v10  ;;  %v246_v25 = vld [vmem:[%s2647_s1 + $0x210] sm:$0xff]  ;;  %v247_v36 = vld [vmem:[%s2647_s1 + $0x218] sm:$0xff]  ;;  %v280_v38 = vld [vmem:[%s2647_s1 + $0x320] sm:$0xff] }
  0x1f   :  { %1675 = vmatpush3.bf16.msra.mxu1 %v2162_v42  ;;  %1645 = vmatprep.subr.bf16.mxu0 %v1644_v43  ;;  %v48_v43 = vadd.f32 %v2146_v32, %v40_v24  ;;  %v41_v45 = vmul.f32 %v2135_v28, %v33_v33  ;;  %v2258_v50 = vpack.c.bf16 %v263_v23, %v262_v20  ;;  %v264_v58 = vld [vmem:[%s2647_s1 + $0x2a0] sm:$0xff]  ;;  %v249_v33 = vld [vmem:[%s2647_s1 + $0x228] sm:$0xff] }
  0x20   :  { %1677 = vmatprep.subr.bf16.mxu1 %v2175_v49  ;;  %79 = vst [vmem:[#allocation2 + $0x8] sm:$0xfc] %v74_v61  ;;  %62 = vst [vmem:[#allocation2] sm:$0xf8] %v57_v62  ;;  %v2238_v30 = vmax.f32 %v47_v16, 0.0  ;;  %v2274_v14 = vpack.c.bf16 %v247_v36, %v246_v25  ;;  %v2276_v15 = vpack.c.bf16 %v281_v41, %v280_v38  ;;  %v283_v36 = vld [vmem:[%s2647_s1 + $0x338] sm:$0xff] }
  0x21   :  { %94 = vst [vmem:[#allocation2 + $0x10] sm:$0xfe] %v89_v2  ;;  %v2269_v10 = vmax.f32 %v48_v43, 0.0  ;;  %v49_v11 = vadd.f32 %v2146_v32, %v41_v45  ;;  %v248_v32 = vld [vmem:[%s2647_s1 + $0x220] sm:$0xff]  ;;  %v266_v43 = vld [vmem:[%s2647_s1 + $0x2b0] sm:$0xff]  ;;  %v267_v45 = vld [vmem:[%s2647_s1 + $0x2b8] sm:$0xff] }
  0x22   :  { %1647 = vmatpush3.bf16.msra.mxu0 %v1646_v59  ;;  %v75_v54 = vrot.slane %v2238_v30, 6  ;;  %v58_v56 = vrot.slane %v2238_v30, 5  ;;  %v265_v59 = vld [vmem:[%s2647_s1 + $0x2a8] sm:$0xff]  ;;  %v90_v7 = vrot.slane %v2238_v30, 7  ;;  %v2656_v12 = vrot.slane %v2238_v30, 2 }
  0x23   :  { %1679 = vmatpush3.bf16.msra.mxu1 %v2191_v60  ;;  %1681 = vmatprep.subr.bf16.mxu0 %v2197_v3  ;;  %v2654_v19 = vrot.slane %v2238_v30, 1  ;;  %v81_v23 = vrot.slane %v2269_v10, 6  ;;  %v66_v24 = vrot.slane %v2269_v10, 5  ;;  %v2657_v25 = vrot.slane %v2269_v10, 7 }
  0x24   :  { %1713 = vmatprep.subr.bf16.mxu1 %v2201_v5  ;;  %v76_v16 = vsel %vm73_vm0, %v74_v61, %v75_v54  ;;  %v59_v20 = vsel %vm56_vm1, %v57_v62, %v58_v56  ;;  %129 = vst [vmem:[#allocation2 + $0x60] sm:$0x3f] %v2656_v12  ;;  %v2292_v61 = vpack.c.bf16 %v265_v59, %v264_v58  ;;  %v282_v62 = vld [vmem:[%s2647_s1 + $0x330] sm:$0xff]  ;;  %v2303_v38 = vmax.f32 %v49_v11, 0.0  ;;  %v251_v59 = vld [vmem:[%s2647_s1 + $0x238] sm:$0xff]  ;;  %v285_v11 = vld [vmem:[%s2647_s1 + $0x348] sm:$0xff] }
  0x25   :  { %114 = vst [vmem:[#allocation2 + $0x58] sm:$0x7f] %v2654_v19  ;;  %v2655_v41 = vrot.slane %v2238_v30, 3  ;;  %86 = vst [vmem:[#allocation2 + $0x78] sm:$0xfc] %v81_v23  ;;  %v2335_v54 = vpack.c.bf16 %v283_v36, %v282_v62  ;;  %v2339_v58 = vpack.c.bf16 %v267_v45, %v266_v43  ;;  %v252_v62 = vld [vmem:[%s2647_s1 + $0x240] sm:$0xff] }
  0x26   :  { %71 = vst [vmem:[#allocation2 + $0x70] sm:$0xf8] %v66_v24  ;;  %101 = vst [vmem:[#allocation2 + $0x80] sm:$0xfe] %v2657_v25  ;;  %v2651_v56 = vrot.slane %v2303_v38, 1  ;;  %v253_v43 = vld [vmem:[%s2647_s1 + $0x248] sm:$0xff] }
  0x27   :  { %v153_v46 = vld [vmem:[#allocation2 + $0x8] sm:$0xff]  ;;  %v152_v47 = vld [vmem:[#allocation2] sm:$0xff]  ;;  %144 = vst [vmem:[#allocation2 + $0x68] sm:$0x1f] %v2655_v41  ;;  %v97_v12 = vrot.slane %v2303_v38, 7  ;;  %v1698_v25 = vpack.c.bf16 %v253_v43, %v252_v62  ;;  %v2659_v43 = vrot.slane %v2238_v30, 2 }
  0x28   :  { %v154_v48 = vld [vmem:[#allocation2 + $0x10] sm:$0xff]  ;;  %356 = vmatprep.mubr.f32.mxu0 %v153_v46  ;;  %v91_v46 = vsel %vm88_vm2, %v89_v2, %v90_v7  ;;  %v2329_v2 = vpack.c.bf16 %v249_v33, %v248_v32  ;;  %v284_v7 = vld [vmem:[%s2647_s1 + $0x340] sm:$0xff]  ;;  %v82_v33 = vrot.slane %v2303_v38, 6  ;;  %121 = vst [vmem:[#allocation2 + $0xc8] sm:$0x7f] %v2651_v56  ;;  %v287_v56 = vld [vmem:[%s2647_s1 + $0x358] sm:$0xff] }
  0x29   :  { %442 = vmatmul.mubr.f32.vlgmr.msra.gmra.mrb[0].mxu1 %v154_v48  ;;  %357 = vmatmul.mubr.f32.vlgmr.msra.gmra.mrb[0].mxu0 %v152_v47  ;;  %v2652_v47 = vrot.slane %v2303_v38, 2  ;;  %v250_v48 = vld [vmem:[%s2647_s1 + $0x230] sm:$0xff]  ;;  %v268_v32 = vld [vmem:[%s2647_s1 + $0x2c0] sm:$0xff]  ;;  %v2374_v45 = vpack.c.bf16 %v285_v11, %v284_v7  ;;  %v271_v11 = vld [vmem:[%s2647_s1 + $0x2d8] sm:$0xff] }
  0x2a   :  { %1715 = vmatpush3.bf16.msra.mxu1 %v2201_v5  ;;  %1683 = vmatpush3.bf16.msra.mxu0 %v2243_v34  ;;  %v1694_v36 = vpack.c.bf16 %v251_v59, %v250_v48  ;;  %v270_v7 = vld [vmem:[%s2647_s1 + $0x2d0] sm:$0xff]  ;;  %v83_v41 = vsel %vm73_vm0, %v81_v23, %v82_v33  ;;  %v255_v33 = vld [vmem:[%s2647_s1 + $0x258] sm:$0xff]  ;;  %v288_v62 = vld [vmem:[%s2647_s1 + $0x360] sm:$0xff] }
  0x2b   :  { %1717 = vmatprep.subr.bf16.mxu1 %v2248_v37  ;;  %1685 = vmatprep.subr.bf16.mxu0 %v2258_v50  ;;  %136 = vst [vmem:[#allocation2 + $0xd0] sm:$0x3f] %v2652_v47  ;;  %v67_v47 = vrot.slane %v2303_v38, 5 }
  0x2c   :  { %361 = vmatprep.mubr.f32.mxu0 %v76_v16  ;;  %446 = vmatprep.mubr.f32.mxu1 %v2238_v30  ;;  %v2653_v16 = vrot.slane %v2303_v38, 3  ;;  %v167_v59 = vld [vmem:[#allocation2 + $0x78] sm:$0xff] }
  0x2d   :  { %362 = vmatmul.mubr.f32.gmra.mrb[2].mxu0 %v59_v20  ;;  %447 = vmatmul.mubr.f32.gmra.mrb[2].mxu1 %v91_v46  ;;  %v269_v20 = vld [vmem:[%s2647_s1 + $0x2c8] sm:$0xff]  ;;  %v286_v46 = vld [vmem:[%s2647_s1 + $0x350] sm:$0xff]  ;;  %v168_v19 = vld [vmem:[#allocation2 + $0x80] sm:$0xff]  ;;  %v68_v23 = vsel %vm56_vm1, %v66_v24, %v67_v47 }
  0x2e   :  { %1719 = vmatpush3.bf16.msra.mxu1 %v2248_v37  ;;  %1687 = vmatpush3.bf16.msra.mxu0 %v2274_v14  ;;  %151 = vst [vmem:[#allocation2 + $0xd8] sm:$0x1f] %v2653_v16  ;;  %v1696_v48 = vpack.c.bf16 %v269_v20, %v268_v32  ;;  %v166_v16 = vld [vmem:[#allocation2 + $0x70] sm:$0xff]  ;;  %v123_v32 = vrot.slane %v2183_v55, 2  ;;  %v138_v20 = vrot.slane %v2183_v55, 3  ;;  %v272_v24 = vld [vmem:[%s2647_s1 + $0x2e0] sm:$0xff] }
  0x2f   :  { %1721 = vmatprep.subr.bf16.mxu1 %v2276_v15  ;;  %1689 = vmatprep.subr.bf16.mxu0 %v2292_v61  ;;  %v273_v47 = vld [vmem:[%s2647_s1 + $0x2e8] sm:$0xff] }
  0x30   :  { %451 = vmatprep.mubr.f32.mxu1 %v2269_v10  ;;  %366 = vmatprep.mubr.f32.mxu0 %v167_v59  ;;  %v2401_v59 = vpack.c.bf16 %v287_v56, %v286_v46  ;;  %v289_v56 = vld [vmem:[%s2647_s1 + $0x368] sm:$0xff]  ;;  %v125_v46 = vsel %vm122_vm3, %v123_v32, %v2659_v43 }
  0x31   :  { %452 = vmatmul.mubr.f32.gmra.mrb[4].mxu1 %v168_v19  ;;  %367 = vmatmul.mubr.f32.gmra.mrb[4].mxu0 %v166_v16  ;;  %v254_v19 = vld [vmem:[%s2647_s1 + $0x250] sm:$0xff]  ;;  %v2406_v16 = vpack.c.bf16 %v271_v11, %v270_v7  ;;  %v257_v32 = vld [vmem:[%s2647_s1 + $0x268] sm:$0xff] }
  0x32   :  { %1723 = vmatpush3.bf16.msra.mxu1 %v2276_v15  ;;  %1691 = vmatpush3.bf16.msra.mxu0 %v2329_v2  ;;  %v2434_v11 = vpack.c.bf16 %v255_v33, %v254_v19  ;;  %v274_v19 = vld [vmem:[%s2647_s1 + $0x2f0] sm:$0xff]  ;;  %v275_v33 = vld [vmem:[%s2647_s1 + $0x2f8] sm:$0xff] }
  0x33   :  { %1725 = vmatprep.subr.bf16.mxu1 %v2335_v54  ;;  %1693 = vmatprep.subr.bf16.mxu0 %v2339_v58 }
  0x34   :  { %371 = vmatprep.mubr.f32.mxu0 %v83_v41  ;;  %456 = vmatprep.mubr.f32.mxu1 %v2303_v38  ;;  %v2658_v41 = vrot.slane %v2269_v10, 7 }
  0x35   :  { %372 = vmatmul.mubr.f32.gmra.mrb[6].mxu0 %v68_v23  ;;  %v2443_v23 = vpack.c.bf16 %v273_v47, %v272_v24  ;;  %v2468_v24 = vpack.c.bf16 %v275_v33, %v274_v19  ;;  %v258_v47 = vld [vmem:[%s2647_s1 + $0x270] sm:$0xff]  ;;  %v130_v19 = vrot.slane %v2269_v10, 2  ;;  %v179_v33 = vld [vmem:[#allocation2 + $0xd8] sm:$0xff] }
  0x36   :  { %1727 = vmatpush3.bf16.msra.mxu1 %v2335_v54  ;;  %1695 = vmatpush3.bf16.msra.mxu0 %v1694_v36  ;;  %v98_v36 = vsel %vm88_vm2, %v2658_v41, %v97_v12  ;;  %v256_v12 = vld [vmem:[%s2647_s1 + $0x260] sm:$0xff]  ;;  %v2440_v41 = vpack.c.bf16 %v289_v56, %v288_v62 }
  0x37   :  { %1729 = vmatprep.subr.bf16.mxu1 %v2374_v45  ;;  %1697 = vmatprep.subr.bf16.mxu0 %v1696_v48  ;;  %v2660_v48 = vrot.slane %v2238_v30, 3  ;;  %v2462_v62 = vpack.c.bf16 %v257_v32, %v256_v12  ;;  %v2661_v12 = vrot.slane %v2238_v30, 1  ;;  %v115_v30 = vrot.slane %v2269_v10, 1 }
  0x38   :  { %457 = vmatmul.mubr.f32.gmra.mrb[6].mxu1 %v98_v36  ;;  %526 = vmatprep.mubr.f32.mxu0 %v125_v46  ;;  %v259_v36 = vld [vmem:[%s2647_s1 + $0x278] sm:$0xff]  ;;  %v108_v46 = vrot.slane %v2183_v55, 1  ;;  %v164_v55 = vld [vmem:[#allocation2 + $0x60] sm:$0xff] }
  0x39   :  { %v140_v7 = vsel %vm137_vm4, %v138_v20, %v2660_v48  ;;  %v291_v20 = vld [vmem:[%s2647_s1 + $0x378] sm:$0xff]  ;;  %v2478_v43 = vpack.c.bf16 %v259_v36, %v258_v47  ;;  %v145_v48 = vrot.slane %v2269_v10, 3  ;;  %v2663_v36 = vrot.slane %v2303_v38, 2 }
  0x3a   :  { %1731 = vmatpush3.bf16.msra.mxu1 %v2374_v45  ;;  %1699 = vmatpush3.bf16.msra.mxu0 %v1698_v25  ;;  %v290_v25 = vld [vmem:[%s2647_s1 + $0x370] sm:$0xff]  ;;  %v110_v32 = vsel %vm107_vm5, %v108_v46, %v2661_v12  ;;  %v163_v47 = vld [vmem:[#allocation2 + $0x58] sm:$0xff] }
  0x3b   :  { %1733 = vmatprep.subr.bf16.mxu1 %v2401_v59  ;;  %1701 = vmatprep.subr.bf16.mxu0 %v2406_v16  ;;  %v2465_v56 = vpack.c.bf16 %v291_v20, %v290_v25  ;;  %v2662_v25 = vrot.slane %v2303_v38, 3  ;;  %v132_v46 = vsel %vm122_vm3, %v130_v19, %v2663_v36 }
  0x3c   :  { %1572 = vmatprep.mubr.f32.mxu1 %v140_v7  ;;  %v165_v7 = vld [vmem:[#allocation2 + $0x68] sm:$0xff] }
  0x3d   :  { %v147_v20 = vsel %vm137_vm4, %v145_v48, %v2662_v25 }
  0x3e   :  { %1735 = vmatpush3.bf16.msra.mxu1 %v2401_v59  ;;  %1703 = vmatpush3.bf16.msra.mxu0 %v2434_v11 }
  0x3f   :  { %1737 = vmatprep.subr.bf16.mxu1 %v2440_v41  ;;  %1705 = vmatprep.subr.bf16.mxu0 %v2443_v23 }
  0x42   :  { %1739 = vmatpush3.bf16.msra.mxu1 %v2440_v41  ;;  %1707 = vmatpush3.bf16.msra.mxu0 %v2462_v62 }
  0x43   :  { %1741 = vmatprep.subr.bf16.mxu1 %v2465_v56  ;;  %1709 = vmatprep.subr.bf16.mxu0 %v2468_v24 }
  0x46   :  { %1743 = vmatpush3.bf16.msra.mxu1 %v2465_v56  ;;  %1711 = vmatpush3.bf16.msra.mxu0 %v2478_v43 }
  0x47   :  { %1777 = vmatprep.subr.bf16.mxu1 %v1914_v8  ;;  %1745 = vmatprep.subr.bf16.mxu0 %v1903_v4  ;;  %v2664_v4 = vrot.slane %v2303_v38, 1 }
  0x49   :  { %1573 = vmatmul.mubr.f32.vlgmr.msra.gmra.mrb[8].mxu1 %v165_v7  ;;  %527 = vmatmul.mubr.f32.vlgmr.msra.gmra.mrb[8].mxu0 %v110_v32  ;;  %v117_v8 = vsel %vm107_vm5, %v115_v30, %v2664_v4 }
  0x4a   :  { %1575 = vmatprep.mubr.f32.mxu1 %v147_v20  ;;  %531 = vmatprep.mubr.f32.mxu0 %v164_v55 }
  0x4b   :  { %1779 = vmatpush3.bf16.msra.mxu1 %v1928_v13  ;;  %1747 = vmatpush3.bf16.msra.mxu0 %v1916_v9  ;;  %v178_v13 = vld [vmem:[#allocation2 + $0xd0] sm:$0xff]  ;;  %v177_v9 = vld [vmem:[#allocation2 + $0xc8] sm:$0xff] }
  0x4c   :  { %1781 = vmatprep.subr.bf16.mxu1 %v1943_v18  ;;  %1749 = vmatprep.subr.bf16.mxu0 %v1941_v17  ;;  %v778_v17 = vld [vmem:[%s2647_s1 + $0x50] sm:$0xff]  ;;  %v779_v18 = vld [vmem:[%s2647_s1 + $0x58] sm:$0xff] }
  0x4d   :  { %1576 = vmatmul.mubr.f32.gmra.mrb[10].mxu1 %v179_v33  ;;  %532 = vmatmul.mubr.f32.gmra.mrb[10].mxu0 %v163_v47 }
  0x4e   :  { %536 = vmatprep.mubr.f32.mxu0 %v132_v46 }
  0x4f   :  { %1783 = vmatpush3.bf16.msra.mxu1 %v1968_v26  ;;  %1751 = vmatpush3.bf16.msra.mxu0 %v1955_v22  ;;  %v1766_v22 = vpack.c.bf16 %v779_v18, %v778_v17  ;;  %v796_v26 = vld [vmem:[%s2647_s1 + $0xe0] sm:$0xff] }
  0x50   :  { %1785 = vmatprep.subr.bf16.mxu1 %v1981_v31  ;;  %1753 = vmatprep.subr.bf16.mxu0 %v1970_v27  ;;  %v797_v27 = vld [vmem:[%s2647_s1 + $0xe8] sm:$0xff] }
  0x51   :  { %537 = vmatmul.mubr.f32.gmra.mrb[12].mxu0 %v117_v8  ;;  %v1768_v31 = vpack.c.bf16 %v797_v27, %v796_v26 }
  0x52   :  { %541 = vmatprep.mubr.f32.mxu0 %v178_v13 }
  0x53   :  { %1787 = vmatpush3.bf16.msra.mxu1 %v2006_v39  ;;  %1755 = vmatpush3.bf16.msra.mxu0 %v1993_v35  ;;  %v780_v35 = vld [vmem:[%s2647_s1 + $0x60] sm:$0xff]  ;;  %v781_v39 = vld [vmem:[%s2647_s1 + $0x68] sm:$0xff] }
  0x54   :  { %1789 = vmatprep.subr.bf16.mxu1 %v2020_v44  ;;  %1757 = vmatprep.subr.bf16.mxu0 %v2008_v40  ;;  %v1770_v40 = vpack.c.bf16 %v781_v39, %v780_v35  ;;  %v798_v44 = vld [vmem:[%s2647_s1 + $0xf0] sm:$0xff] }
  0x55   :  { %542 = vmatmul.mubr.f32.gmra.mrb[14].mxu0 %v177_v9 }
  0x57   :  { %1791 = vmatpush3.bf16.msra.mxu1 %v2045_v52  ;;  %1759 = vmatpush3.bf16.msra.mxu0 %v2041_v51  ;;  %v799_v51 = vld [vmem:[%s2647_s1 + $0xf8] sm:$0xff] }
  0x58   :  { %1793 = vmatprep.subr.bf16.mxu1 %v2059_v57  ;;  %1761 = vmatprep.subr.bf16.mxu0 %v2047_v53  ;;  %v1772_v52 = vpack.c.bf16 %v799_v51, %v798_v44  ;;  %v782_v53 = vld [vmem:[%s2647_s1 + $0x70] sm:$0xff]  ;;  %v783_v57 = vld [vmem:[%s2647_s1 + $0x78] sm:$0xff] }
  0x5b   :  { %1795 = vmatpush3.bf16.msra.mxu1 %v2081_v0  ;;  %1763 = vmatpush3.bf16.msra.mxu0 %v2077_v63  ;;  %v1774_v63 = vpack.c.bf16 %v783_v57, %v782_v53  ;;  %v1234_v53 = vld [vmem:[%s2648_s2 + $0x2] ss:$0 sm:$0xff] }
  0x5c   :  { %1797 = vmatprep.subr.bf16.mxu1 %v2095_v6  ;;  %1765 = vmatprep.subr.bf16.mxu0 %v2083_v1 }
  0x5f   :  { %1799 = vmatpush3.bf16.msra.mxu1 %v2124_v21  ;;  %1767 = vmatpush3.bf16.msra.mxu0 %v1766_v22 }
  0x60   :  { %1801 = vmatprep.subr.bf16.mxu1 %v2138_v29  ;;  %1769 = vmatprep.subr.bf16.mxu0 %v1768_v31 }
  0x63   :  { %1803 = vmatpush3.bf16.msra.mxu1 %v2162_v42  ;;  %1771 = vmatpush3.bf16.msra.mxu0 %v1770_v40 }
  0x64   :  { %1805 = vmatprep.subr.bf16.mxu1 %v2175_v49  ;;  %1773 = vmatprep.subr.bf16.mxu0 %v1772_v52 }
  0x67   :  { %1807 = vmatpush3.bf16.msra.mxu1 %v2191_v60  ;;  %1775 = vmatpush3.bf16.msra.mxu0 %v1774_v63 }
  0x68   :  { %1841 = vmatprep.subr.bf16.mxu1 %v2201_v5  ;;  %1809 = vmatprep.subr.bf16.mxu0 %v2197_v3 }
  0xfc   :  { %v1312_v0 = vpop.f32.mrb[0].mxu1  ;;  %v1268_v1 = vpop.f32.mrb[0].mxu0 }
  0xfd   :  { %v1313_v6 = vpop.f32.mrb[1].mxu1  ;;  %v1269_v21 = vpop.f32.mrb[1].mxu0 }
  0xfe   :  { %v1314_v29 = vadd.f32 %v1313_v6, %v1312_v0  ;;  %v1270_v42 = vadd.f32 %v1269_v21, %v1268_v1 }
 0x100   :  { %v444_v49 = vadd.f32 %v1314_v29, %v1270_v42  ;;  %v1271_v60 = vpop.f32.mrb[2].mxu0  ;;  %v1315_v38 = vpop.f32.mrb[2].mxu1 }
 0x101   :  { %v1272_v10 = vpop.f32.mrb[3].mxu0  ;;  %v1316_v7 = vpop.f32.mrb[3].mxu1 }
 0x102   :  { %v1273_v48 = vadd.f32 %v1272_v10, %v1271_v60  ;;  %v1317_v12 = vadd.f32 %v1316_v7, %v1315_v38 }
 0x104   :  { %v449_v32 = vadd.f32 %v1317_v12, %v1273_v48  ;;  %v1318_v25 = vpop.f32.mrb[4].mxu1  ;;  %v1274_v20 = vpop.f32.mrb[4].mxu0 }
 0x105   :  { %v1319_v55 = vpop.f32.mrb[5].mxu1  ;;  %v1275_v19 = vpop.f32.mrb[5].mxu0 }
 0x106   :  { %v1320_v33 = vadd.f32 %v1319_v55, %v1318_v25  ;;  %v1276_v3 = vadd.f32 %v1275_v19, %v1274_v20 }
 0x108   :  { %v454_v47 = vadd.f32 %v1320_v33, %v1276_v3  ;;  %v1277_v30 = vpop.f32.mrb[6].mxu0 }
 0x109   :  { %v1278_v36 = vpop.f32.mrb[7].mxu0 }
 0x10a   :  { %v1279_v4 = vadd.f32 %v1278_v36, %v1277_v30 }
 0x10b   :  { %v1321_v46 = vpop.f32.mrb[6].mxu1 }
 0x10c   :  { %v1322_v8 = vpop.f32.mrb[7].mxu1 }
 0x10d   :  { %v1323_v13 = vadd.f32 %v1322_v8, %v1321_v46 }
 0x10f   :  { %v459_v9 = vadd.f32 %v1323_v13, %v1279_v4 }
 0x11c   :  { %v1574_v17 = vpop.f32.mrb[8].mxu1  ;;  %v1356_v18 = vpop.f32.mrb[8].mxu0 }
 0x11d   :  { %v613_v22 = vpop.f32.mrb[9].mxu1  ;;  %v1357_v26 = vpop.f32.mrb[9].mxu0 }
 0x11e   :  { %v1358_v27 = vadd.f32 %v1357_v26, %v1356_v18 }
 0x120   :  { %v1577_v31 = vpop.f32.mrb[10].mxu1  ;;  %v1359_v35 = vpop.f32.mrb[10].mxu0  ;;  %v529_v39 = vadd.f32 %v1358_v27, %v444_v49 }
 0x121   :  { %v623_v40 = vpop.f32.mrb[11].mxu1  ;;  %v1360_v44 = vpop.f32.mrb[11].mxu0 }
 0x122   :  { %v614_v51 = vadd.f32 %v613_v22, %v529_v39  ;;  %v1361_v52 = vadd.f32 %v1360_v44, %v1359_v35 }
 0x124   :  { %v632_v57 = vmul.f32 %v2135_v28, %v614_v51  ;;  %v534_v63 = vadd.f32 %v1361_v52, %v449_v32  ;;  %v1362_v0 = vpop.f32.mrb[12].mxu0 }
 0x125   :  { %v1363_v1 = vpop.f32.mrb[13].mxu0 }
 0x126   :  { %v640_v6 = vadd.f32 %v1234_v53, %v632_v57  ;;  %v619_v21 = vadd.f32 %v1574_v17, %v534_v63  ;;  %v1364_v29 = vadd.f32 %v1363_v1, %v1362_v0 }
 0x128   :  { %v644_v42 = vmax.f32 %v640_v6, 0.0  ;;  %v633_v60 = vmul.f32 %v2135_v28, %v619_v21  ;;  %v1365_v49 = vpop.f32.mrb[14].mxu0  ;;  %v539_v10 = vadd.f32 %v1364_v29, %v454_v47 }
 0x129   :  { %v1366_v38 = vpop.f32.mrb[15].mxu0 }
 0x12a   :  { %v650_v48 = vrot.slane %v644_v42, 5  ;;  %v666_v7 = vrot.slane %v644_v42, 6  ;;  %v680_v12 = vrot.slane %v644_v42, 7  ;;  %1033 = vmatprep.mubr.f32.mxu1 %v644_v42  ;;  %v641_v25 = vadd.f32 %v1234_v53, %v633_v60 }
 0x12b   :  { %v1367_v20 = vadd.f32 %v1366_v38, %v1365_v49  ;;  %v624_v32 = vadd.f32 %v623_v40, %v539_v10  ;;  %v698_v33 = vrot.slane %v644_v42, 1  ;;  %v712_v3 = vrot.slane %v644_v42, 2 }
 0x12c   :  { %655 = vst [vmem:[#allocation2] sm:$0xf8] %v650_v48  ;;  %685 = vst [vmem:[#allocation2 + $0x10] sm:$0xfe] %v680_v12  ;;  %v645_v55 = vmax.f32 %v641_v25, 0.0  ;;  %v726_v30 = vrot.slane %v644_v42, 3 }
 0x12d   :  { %671 = vst [vmem:[#allocation2 + $0x8] sm:$0xfc] %v666_v7  ;;  %v544_v19 = vadd.f32 %v1367_v20, %v459_v9  ;;  %v634_v36 = vmul.f32 %v2135_v28, %v624_v32  ;;  %v839_v20 = vld [vmem:[%s2647_s1 + $0x238] sm:$0xff] }
 0x12e   :  { %v651_v46 = vrot.slane %v645_v55, 5  ;;  %v667_v47 = vrot.slane %v645_v55, 6  ;;  %v681_v4 = vrot.slane %v645_v55, 7  ;;  %v699_v8 = vrot.slane %v645_v55, 1 }
 0x12f   :  { %v713_v13 = vrot.slane %v645_v55, 2  ;;  %v727_v17 = vrot.slane %v645_v55, 3  ;;  %v629_v18 = vadd.f32 %v1577_v31, %v544_v19  ;;  %v642_v22 = vadd.f32 %v1234_v53, %v634_v36  ;;  %v856_v19 = vld [vmem:[%s2647_s1 + $0x2c0] sm:$0xff] }
 0x130   :  { %v2566_v26 = vsel %vm107_vm5, %v698_v33, %v699_v8  ;;  %704 = vst [vmem:[#allocation2 + $0x58] sm:$0x7f] %v699_v8  ;;  %v668_v27 = vsel %vm73_vm0, %v666_v7, %v667_v47  ;;  %v682_v9 = vsel %vm88_vm2, %v680_v12, %v681_v4  ;;  %v652_v35 = vsel %vm56_vm1, %v650_v48, %v651_v46 }
 0x131   :  { %718 = vst [vmem:[#allocation2 + $0x60] sm:$0x3f] %v713_v13  ;;  %732 = vst [vmem:[#allocation2 + $0x68] sm:$0x1f] %v727_v17  ;;  %v635_v39 = vmul.f32 %v2135_v28, %v629_v18  ;;  %v646_v40 = vmax.f32 %v642_v22, 0.0  ;;  %v2573_v44 = vsel %vm137_vm4, %v726_v30, %v727_v17  ;;  %v2576_v31 = vsel %vm122_vm3, %v712_v3, %v713_v13  ;;  %v841_v3 = vld [vmem:[%s2647_s1 + $0x248] sm:$0xff] }
 0x133   :  { %v742_v52 = vld [vmem:[#allocation2 + $0x10] sm:$0xff]  ;;  %v740_v57 = vld [vmem:[#allocation2] sm:$0xff]  ;;  %v643_v63 = vadd.f32 %v1234_v53, %v635_v39  ;;  %v659_v0 = vrot.slane %v646_v40, 5  ;;  %v673_v1 = vrot.slane %v646_v40, 6  ;;  %v687_v6 = vrot.slane %v646_v40, 7 }
 0x134   :  { %v741_v51 = vld [vmem:[#allocation2 + $0x8] sm:$0xff]  ;;  %1034 = vmatmul.mubr.f32.vlgmr.msra.gmra.mrb[12].mxu1 %v742_v52  ;;  %v705_v21 = vrot.slane %v646_v40, 1  ;;  %v719_v10 = vrot.slane %v646_v40, 2  ;;  %v733_v38 = vrot.slane %v646_v40, 3 }
 0x135   :  { %948 = vmatprep.mubr.f32.mxu0 %v741_v51  ;;  %1843 = vmatpush3.bf16.msra.mxu1 %v2201_v5  ;;  %v647_v28 = vmax.f32 %v643_v63, 0.0  ;;  %664 = vst [vmem:[#allocation2 + $0x70] sm:$0xf8] %v659_v0  ;;  %678 = vst [vmem:[#allocation2 + $0x78] sm:$0xfc] %v673_v1 }
 0x136   :  { %949 = vmatmul.mubr.f32.vlgmr.msra.gmra.mrb[16].mxu0 %v740_v57  ;;  %692 = vst [vmem:[#allocation2 + $0x80] sm:$0xfe] %v687_v6  ;;  %1038 = vmatprep.mubr.f32.mxu1 %v645_v55 }
 0x137   :  { %1811 = vmatpush3.bf16.msra.mxu0 %v2243_v34  ;;  %1845 = vmatprep.subr.bf16.mxu1 %v2248_v37  ;;  %v660_v53 = vrot.slane %v647_v28, 5  ;;  %v674_v29 = vrot.slane %v647_v28, 6  ;;  %v688_v42 = vrot.slane %v647_v28, 7  ;;  %v706_v60 = vrot.slane %v647_v28, 1 }
 0x138   :  { %1813 = vmatprep.subr.bf16.mxu0 %v2258_v50  ;;  %953 = vmatprep.mubr.f32.mxu0 %v668_v27  ;;  %v720_v5 = vrot.slane %v647_v28, 2  ;;  %v734_v49 = vrot.slane %v647_v28, 3 }
 0x139   :  { %1039 = vmatmul.mubr.f32.gmra.mrb[14].mxu1 %v682_v9  ;;  %711 = vst [vmem:[#allocation2 + $0xc8] sm:$0x7f] %v706_v60  ;;  %v661_v34 = vsel %vm56_vm1, %v659_v0, %v660_v53  ;;  %v675_v48 = vsel %vm73_vm0, %v673_v1, %v674_v29  ;;  %v689_v50 = vsel %vm88_vm2, %v687_v6, %v688_v42 }
 0x13a   :  { %1847 = vmatpush3.bf16.msra.mxu1 %v2248_v37  ;;  %954 = vmatmul.mubr.f32.gmra.mrb[18].mxu0 %v652_v35  ;;  %v707_v7 = vsel %vm107_vm5, %v705_v21, %v706_v60  ;;  %725 = vst [vmem:[#allocation2 + $0xd0] sm:$0x3f] %v720_v5  ;;  %739 = vst [vmem:[#allocation2 + $0xd8] sm:$0x1f] %v734_v49  ;;  %v721_v12 = vsel %vm122_vm3, %v719_v10, %v720_v5  ;;  %v838_v37 = vld [vmem:[%s2647_s1 + $0x230] sm:$0xff] }
 0x13b   :  { %1815 = vmatpush3.bf16.msra.mxu0 %v2274_v14  ;;  %v735_v25 = vsel %vm137_vm4, %v733_v38, %v734_v49  ;;  %1043 = vmatprep.mubr.f32.mxu1 %v646_v40  ;;  %v1822_v33 = vpack.c.bf16 %v839_v20, %v838_v37 }
 0x13c   :  { %1849 = vmatprep.subr.bf16.mxu1 %v2276_v15  ;;  %1817 = vmatprep.subr.bf16.mxu0 %v2292_v61  ;;  %v755_v14 = vld [vmem:[#allocation2 + $0x78] sm:$0xff]  ;;  %v754_v55 = vld [vmem:[#allocation2 + $0x70] sm:$0xff]  ;;  %v857_v61 = vld [vmem:[%s2647_s1 + $0x2c8] sm:$0xff] }
 0x13d   :  { %v756_v32 = vld [vmem:[#allocation2 + $0x80] sm:$0xff]  ;;  %958 = vmatprep.mubr.f32.mxu0 %v755_v14  ;;  %v1824_v30 = vpack.c.bf16 %v857_v61, %v856_v19 }
 0x13e   :  { %1851 = vmatpush3.bf16.msra.mxu1 %v2276_v15  ;;  %959 = vmatmul.mubr.f32.gmra.mrb[20].mxu0 %v754_v55  ;;  %v840_v15 = vld [vmem:[%s2647_s1 + $0x240] sm:$0xff] }
 0x13f   :  { %1044 = vmatmul.mubr.f32.gmra.mrb[16].mxu1 %v756_v32  ;;  %1819 = vmatpush3.bf16.msra.mxu0 %v2329_v2  ;;  %v1826_v2 = vpack.c.bf16 %v841_v3, %v840_v15 }
 0x140   :  { %1048 = vmatprep.mubr.f32.mxu1 %v647_v28  ;;  %1853 = vmatprep.subr.bf16.mxu1 %v2335_v54 }
 0x141   :  { %1821 = vmatprep.subr.bf16.mxu0 %v2339_v58  ;;  %963 = vmatprep.mubr.f32.mxu0 %v675_v48  ;;  %v752_v58 = vld [vmem:[#allocation2 + $0x60] sm:$0xff] }
 0x142   :  { %1855 = vmatpush3.bf16.msra.mxu1 %v2335_v54  ;;  %964 = vmatmul.mubr.f32.gmra.mrb[22].mxu0 %v661_v34  ;;  %v753_v54 = vld [vmem:[#allocation2 + $0x68] sm:$0xff] }
 0x143   :  { %1049 = vmatmul.mubr.f32.gmra.mrb[18].mxu1 %v689_v50  ;;  %1823 = vmatpush3.bf16.msra.mxu0 %v1822_v33 }
 0x144   :  { %1610 = vmatprep.mubr.f32.mxu1 %v2573_v44  ;;  %1857 = vmatprep.subr.bf16.mxu1 %v2374_v45 }
 0x145   :  { %1118 = vmatprep.mubr.f32.mxu0 %v2576_v31  ;;  %1825 = vmatprep.subr.bf16.mxu0 %v1824_v30 }
 0x146   :  { %1859 = vmatpush3.bf16.msra.mxu1 %v2374_v45  ;;  %v767_v45 = vld [vmem:[#allocation2 + $0xd8] sm:$0xff] }
 0x147   :  { %1827 = vmatpush3.bf16.msra.mxu0 %v1826_v2  ;;  %1861 = vmatprep.subr.bf16.mxu1 %v2401_v59 }
 0x148   :  { %1829 = vmatprep.subr.bf16.mxu0 %v2406_v16  ;;  %v766_v16 = vld [vmem:[#allocation2 + $0xd0] sm:$0xff] }
 0x14a   :  { %1863 = vmatpush3.bf16.msra.mxu1 %v2401_v59  ;;  %v751_v59 = vld [vmem:[#allocation2 + $0x58] sm:$0xff] }
 0x14b   :  { %1831 = vmatpush3.bf16.msra.mxu0 %v2434_v11  ;;  %1865 = vmatprep.subr.bf16.mxu1 %v2440_v41  ;;  %v765_v11 = vld [vmem:[#allocation2 + $0xc8] sm:$0xff] }
 0x14c   :  { %1833 = vmatprep.subr.bf16.mxu0 %v2443_v23 }
 0x14e   :  { %1867 = vmatpush3.bf16.msra.mxu1 %v2440_v41 }
 0x14f   :  { %1835 = vmatpush3.bf16.msra.mxu0 %v2462_v62  ;;  %1869 = vmatprep.subr.bf16.mxu1 %v2465_v56 }
 0x150   :  { %1837 = vmatprep.subr.bf16.mxu0 %v2468_v24  ;;  %v1235_v24 = vld [vmem:[%s2648_s2 + $0x3] ss:$0 sm:$0xff] }
 0x152   :  { %1871 = vmatpush3.bf16.msra.mxu1 %v2465_v56 }
 0x153   :  { %1839 = vmatpush3.bf16.msra.mxu0 %v2478_v43 }
 0x155   :  { %1611 = vmatmul.mubr.f32.vlgmr.msra.gmra.mrb[20].mxu1 %v753_v54 }
 0x156   :  { %1119 = vmatmul.mubr.f32.vlgmr.msra.gmra.mrb[24].mxu0 %v2566_v26  ;;  %1613 = vmatprep.mubr.f32.mxu1 %v735_v25 }
 0x157   :  { %1123 = vmatprep.mubr.f32.mxu0 %v752_v58 }
 0x159   :  { %1614 = vmatmul.mubr.f32.gmra.mrb[22].mxu1 %v767_v45 }
 0x15a   :  { %1124 = vmatmul.mubr.f32.gmra.mrb[26].mxu0 %v751_v59 }
 0x15b   :  { %1128 = vmatprep.mubr.f32.mxu0 %v721_v12 }
 0x15e   :  { %1129 = vmatmul.mubr.f32.gmra.mrb[28].mxu0 %v707_v7 }
 0x15f   :  { %1133 = vmatprep.mubr.f32.mxu0 %v766_v16 }
 0x162   :  { %1134 = vmatmul.mubr.f32.gmra.mrb[30].mxu0 %v765_v11 }
 0x207   :  { %v1464_v41 = vpop.f32.mrb[12].mxu1 }
 0x208   :  { %v1465_v62 = vpop.f32.mrb[13].mxu1 }
 0x209   :  { %v1420_v23 = vpop.f32.mrb[16].mxu0  ;;  %v1466_v56 = vadd.f32 %v1465_v62, %v1464_v41 }
 0x20a   :  { %v1421_v43 = vpop.f32.mrb[17].mxu0 }
 0x20b   :  { %v1422_v36 = vadd.f32 %v1421_v43, %v1420_v23 }
 0x20c   :  { %v1467_v46 = vpop.f32.mrb[14].mxu1 }
 0x20d   :  { %v951_v47 = vadd.f32 %v1422_v36, %v1235_v24  ;;  %v1423_v4 = vpop.f32.mrb[18].mxu0  ;;  %v1468_v8 = vpop.f32.mrb[15].mxu1 }
 0x20e   :  { %v1469_v13 = vadd.f32 %v1468_v8, %v1467_v46  ;;  %v1424_v17 = vpop.f32.mrb[19].mxu0 }
 0x20f   :  { %v1425_v18 = vadd.f32 %v1424_v17, %v1423_v4  ;;  %v1036_v22 = vadd.f32 %v1466_v56, %v951_v47 }
 0x211   :  { %v956_v26 = vadd.f32 %v1425_v18, %v1235_v24  ;;  %v1426_v39 = vpop.f32.mrb[20].mxu0 }
 0x212   :  { %v1470_v27 = vpop.f32.mrb[16].mxu1  ;;  %v1427_v44 = vpop.f32.mrb[21].mxu0 }
 0x213   :  { %v1471_v9 = vpop.f32.mrb[17].mxu1  ;;  %v1041_v35 = vadd.f32 %v1469_v13, %v956_v26  ;;  %v1428_v31 = vadd.f32 %v1427_v44, %v1426_v39 }
 0x214   :  { %v1472_v40 = vadd.f32 %v1471_v9, %v1470_v27 }
 0x215   :  { %v961_v57 = vadd.f32 %v1428_v31, %v1235_v24  ;;  %v1429_v63 = vpop.f32.mrb[22].mxu0 }
 0x216   :  { %v1473_v51 = vpop.f32.mrb[18].mxu1  ;;  %v1430_v1 = vpop.f32.mrb[23].mxu0 }
 0x217   :  { %v1474_v52 = vpop.f32.mrb[19].mxu1  ;;  %v1431_v6 = vadd.f32 %v1430_v1, %v1429_v63  ;;  %v1046_v28 = vadd.f32 %v1472_v40, %v961_v57 }
 0x218   :  { %v1475_v0 = vadd.f32 %v1474_v52, %v1473_v51 }
 0x219   :  { %v966_v21 = vadd.f32 %v1431_v6, %v1235_v24 }
 0x21b   :  { %v1051_v53 = vadd.f32 %v1475_v0, %v966_v21 }
 0x228   :  { %v1612_v29 = vpop.f32.mrb[20].mxu1 }
 0x229   :  { %v1508_v42 = vpop.f32.mrb[24].mxu0  ;;  %v1205_v60 = vpop.f32.mrb[21].mxu1 }
 0x22a   :  { %v1509_v5 = vpop.f32.mrb[25].mxu0 }
 0x22b   :  { %v1510_v49 = vadd.f32 %v1509_v5, %v1508_v42 }
 0x22c   :  { %v1615_v10 = vpop.f32.mrb[22].mxu1 }
 0x22d   :  { %v1121_v38 = vadd.f32 %v1510_v49, %v1036_v22  ;;  %v1511_v34 = vpop.f32.mrb[26].mxu0  ;;  %v1215_v48 = vpop.f32.mrb[23].mxu1 }
 0x22e   :  { %v1512_v50 = vpop.f32.mrb[27].mxu0 }
 0x22f   :  { %v1206_v7 = vadd.f32 %v1205_v60, %v1121_v38  ;;  %v1513_v12 = vadd.f32 %v1512_v50, %v1511_v34 }
 0x231   :  { %1224 = vst [vmem:[%s2650_s3] sm:$0xff] %v1206_v7  ;;  %v1126_v25 = vadd.f32 %v1513_v12, %v1041_v35  ;;  %v1514_v37 = vpop.f32.mrb[28].mxu0 }
 0x232   :  { %v1515_v20 = vpop.f32.mrb[29].mxu0 }
 0x233   :  { %v1211_v14 = vadd.f32 %v1612_v29, %v1126_v25  ;;  %v1516_v32 = vadd.f32 %v1515_v20, %v1514_v37 }
 0x235   :  { %1225 = vst [vmem:[%s2650_s3 + $0x8] sm:$0xff] %v1211_v14  ;;  %v1131_v55 = vadd.f32 %v1516_v32, %v1046_v28  ;;  %v1517_v19 = vpop.f32.mrb[30].mxu0 }
 0x236   :  { %v1518_v61 = vpop.f32.mrb[31].mxu0 }
 0x237   :  { %v1216_v33 = vadd.f32 %v1215_v48, %v1131_v55  ;;  %v1519_v15 = vadd.f32 %v1518_v61, %v1517_v19 }
 0x239   :  { %1226 = vst [vmem:[%s2650_s3 + $0x10] sm:$0xff] %v1216_v33  ;;  %v1136_v3 = vadd.f32 %v1519_v15, %v1051_v53 }
 0x23b   :  { %v1221_v30 = vadd.f32 %v1615_v10, %v1136_v3 }
 0x23d   :  { %1227 = vst [vmem:[%s2650_s3 + $0x18] sm:$0xff] %v1221_v30 }

</bundles_post_ra>
